<compile_context>
chip_gen: v7x
topology: tpu7x:2x2x1
jax: 0.10.0
libtpu: 0.0.40
codegen_flags: <defaults>
</compile_context>

<pallas_src>
import functools
import math

import jax
import jax.numpy as jnp
from jax import lax
from jax.experimental import pallas as pl
from jax.experimental.pallas import tpu as pltpu


def _round_up(x, m):
    return (x + m - 1) // m * m


def _vq_sup_kernel(offs_ref, x_ref, w_ref, w2_ref, q_ref, idx_ref, mse_ref,
                   *, num_embeddings):
    """Class-conditioned VQ for a block of TB samples.

    offs_ref : VMEM (TB, 1)   int32, class_index * E per sample (valid column start)
    x_ref    : VMEM (TB, K)   flattened inputs
    w_ref    : VMEM (LEp, K)  all class codebooks stacked (rows >= L*E are zero pad)
    w2_ref   : VMEM (1, LEp)  precomputed |e|^2 per stacked codebook row
    q_ref    : VMEM (TB, K)   quantized outputs
    idx_ref  : VMEM (TB, 1)   int32 within-class argmin index
    mse_ref  : VMEM (TB, 1)   per-sample mean squared error (quantized vs input)
    """
    E = num_embeddings
    tb, K = x_ref.shape
    LEp = w_ref.shape[0]

    x = x_ref[...]                                   # (TB, K) f32
    w = w_ref[...]                                   # (LEp, K) f32

    # distances to ALL codebook rows in one MXU matmul; |e|^2 precomputed outside.
    x2 = jnp.sum(x * x, axis=1, keepdims=True)       # (TB, 1)
    xw = lax.dot_general(x, w, (((1,), (1,)), ((), ())),
                         preferred_element_type=jnp.float32)   # (TB, LEp)
    dist = x2 + w2_ref[...] - 2.0 * xw               # (TB, LEp)

    # mask columns outside each sample's class block (also masks the LEp padding).
    col = lax.broadcasted_iota(jnp.int32, (tb, LEp), 1)
    offs = offs_ref[...]                             # (TB, 1) int32
    valid = (col >= offs) & (col < offs + E)
    dist = jnp.where(valid, dist, jnp.float32(1e30))

    # argmin with first-index tie-break (matches torch.argmin / jnp.argmin).
    dmin = jnp.min(dist, axis=1, keepdims=True)                      # (TB, 1)
    gidx = jnp.min(jnp.where(dist <= dmin, col, LEp),
                   axis=1, keepdims=True)                            # (TB, 1) global col

    # row-select via one-hot matmul (MXU; sample dim is batched so it is not wasted).
    enc = (col == gidx).astype(jnp.float32)                          # (TB, LEp)
    q = jnp.dot(enc, w, preferred_element_type=jnp.float32)          # (TB, K)

    q_ref[...] = q.astype(q_ref.dtype)
    idx_ref[...] = (gidx - offs).astype(jnp.int32)                   # within-class index
    d = q - x
    mse_ref[...] = jnp.sum(d * d, axis=1, keepdims=True) * jnp.float32(1.0 / K)


def prepare_codebook(embeddings_weight, num_embeddings, embedding_dim):
    """One-time prep (hoisted out of the per-call path): stack all per-class codebooks
    along the row axis, pad rows to a multiple of 128 lanes, precompute |e|^2."""
    L = embeddings_weight.shape[0]
    E, K = num_embeddings, embedding_dim
    w_all = embeddings_weight.reshape(L * E, K).astype(jnp.float32)
    LE = L * E
    LEp = _round_up(LE, 128)
    if LEp != LE:
        w_all = jnp.pad(w_all, ((0, LEp - LE), (0, 0)))
    w2 = jnp.sum(w_all * w_all, axis=1).reshape(1, LEp)
    return w_all, w2


def vector_quantizer_supervised_forward(inputs, class_indices, prepared_codebook,
                                        num_embeddings, embedding_dim,
                                        commitment_cost, *, block_b=128):
    """Forward pass. Returns (loss, quantized, perplexity, encodings)."""
    w_all, w2 = prepared_codebook
    B = inputs.shape[0]
    K = math.prod(inputs.shape[1:])
    assert K == embedding_dim, "C*D*H*W must equal embedding_dim"
    E = num_embeddings
    LEp = w_all.shape[0]

    flat = inputs.reshape(B, K).astype(jnp.float32)
    cls = jnp.asarray(class_indices, dtype=jnp.int32)
    offs = (cls * E).reshape(B, 1)

    # Batch samples per grid step; pad B to a multiple of the block.
    TB = min(block_b, _round_up(B, 8))
    Bp = _round_up(B, TB)
    if Bp != B:
        flat = jnp.pad(flat, ((0, Bp - B), (0, 0)))
        offs = jnp.pad(offs, ((0, Bp - B), (0, 0)))

    kernel = functools.partial(_vq_sup_kernel, num_embeddings=E)

    grid_spec = pltpu.PrefetchScalarGridSpec(
        num_scalar_prefetch=0,
        grid=(Bp // TB,),
        in_specs=[
            pl.BlockSpec((TB, 1), lambda i: (i, 0)),     # class offsets
            pl.BlockSpec((TB, K), lambda i: (i, 0)),     # inputs
            pl.BlockSpec((LEp, K), lambda i: (0, 0)),    # stacked codebooks (VMEM-resident)
            pl.BlockSpec((1, LEp), lambda i: (0, 0)),    # precomputed |e|^2
        ],
        out_specs=[
            pl.BlockSpec((TB, K), lambda i: (i, 0)),     # quantized
            pl.BlockSpec((TB, 1), lambda i: (i, 0)),     # argmin index (int32)
            pl.BlockSpec((TB, 1), lambda i: (i, 0)),     # per-sample mse
        ],
    )

    q_flat, idx, mse = pl.pallas_call(
        kernel,
        grid_spec=grid_spec,
        out_shape=(
            jax.ShapeDtypeStruct((Bp, K), jnp.float32),
            jax.ShapeDtypeStruct((Bp, 1), jnp.int32),
            jax.ShapeDtypeStruct((Bp, 1), jnp.float32),
        ),
        compiler_params=pltpu.CompilerParams(
            dimension_semantics=("parallel",)),
    )(offs, flat, w_all, w2)

    q_flat = q_flat[:B]
    idx = idx[:B, 0]
    mse = mse[:B, 0]

    # Forward value of q_latent + commitment * e_latent (detach only affects grads).
    loss = (1.0 + commitment_cost) * jnp.mean(mse)
    encodings = jax.nn.one_hot(idx, E, dtype=jnp.float32)
    # Per-sample perplexity over a batch-of-one one-hot is the data-independent
    # constant exp(-log(1 + 1e-10)); computed on the host instead of in-kernel.
    perplexity = jnp.exp(-jnp.log(jnp.float32(1.0) + jnp.float32(1e-10)))
    # Straight-through: forward value == quantized.
    quantized = q_flat.reshape(inputs.shape)
    return loss, quantized, perplexity, encodings


def _reference_forward(inputs, class_indices, embeddings_weight,
                       num_embeddings, embedding_dim, commitment_cost):
    """Pure-JAX reference mirroring the module's per-sample loop (no rotation)."""
    B = inputs.shape[0]
    flat = inputs.reshape(B, -1)
    emb = embeddings_weight.reshape(-1, num_embeddings, embedding_dim)
    losses, qs, perps, encs = [], [], [], []
    for b in range(B):
        w = emb[int(class_indices[b])]
        x = flat[b:b + 1]
        dist = (jnp.sum(x ** 2, axis=1, keepdims=True)
                + jnp.sum(w ** 2, axis=1) - 2.0 * x @ w.T)
        i = jnp.argmin(dist, axis=1)
        enc = jax.nn.one_hot(i, num_embeddings, dtype=jnp.float32)
        q = enc @ w
        mse = jnp.mean((q - x) ** 2)
        losses.append((1.0 + commitment_cost) * mse)
        qs.append(q)
        avg = jnp.mean(enc, axis=0)
        perps.append(jnp.exp(-jnp.sum(avg * jnp.log(avg + 1e-10))))
        encs.append(enc)
    return (jnp.mean(jnp.stack(losses)),
            jnp.concatenate(qs, axis=0).reshape(inputs.shape),
            jnp.mean(jnp.stack(perps)),
            jnp.concatenate(encs, axis=0))


if __name__ == "__main__":
    key = jax.random.PRNGKey(0)
    B, C, D, H, W = 2, 4, 4, 4, 4
    embedding_dim = C * D * H * W            # 256
    num_embeddings = 16
    labels = ["car", "chair", "table"]
    commitment_cost = 0.25

    k1, k2 = jax.random.split(key)
    inputs = jax.random.normal(k1, (B, C, D, H, W), dtype=jnp.float32)
    # Deterministic stand-in for the pickle-initialized per-class codebooks.
    embeddings_weight = 0.1 * jax.random.normal(
        k2, (len(labels), num_embeddings * embedding_dim), dtype=jnp.float32)

    classes = ["chair", "car"]
    class_indices = jnp.array([labels.index(c) for c in classes], dtype=jnp.int32)

    # One-time codebook prep (hoisted out of the per-call path).
    prepared = prepare_codebook(embeddings_weight, num_embeddings, embedding_dim)

    out = vector_quantizer_supervised_forward(
        inputs, class_indices, prepared,
        num_embeddings, embedding_dim, commitment_cost)
    loss, quantized, perplexity, encodings = jax.block_until_ready(out)

    # Sanity check against pure-JAX reference.
    rloss, rq, rperp, renc = _reference_forward(
        inputs, class_indices, embeddings_weight,
        num_embeddings, embedding_dim, commitment_cost)
    assert jnp.allclose(loss, rloss, atol=1e-5), (loss, rloss)
    assert jnp.allclose(quantized, rq, atol=1e-5)
    assert jnp.allclose(perplexity, rperp, atol=1e-5)
    assert jnp.allclose(encodings, renc, atol=1e-6)

    print("KERNEL_OK")
</pallas_src>

<mosaic_0001>
module attributes {stable_mosaic.version = 11 : i64} {
  func.func @_vq_sup_kernel(%arg0: i32, %arg1: memref<8x1xi32, #tpu.memory_space<vmem>>, %arg2: memref<8x256xf32, #tpu.memory_space<vmem>>, %arg3: memref<128x256xf32, #tpu.memory_space<vmem>>, %arg4: memref<1x128xf32, #tpu.memory_space<vmem>>, %arg5: memref<8x256xf32, #tpu.memory_space<vmem>>, %arg6: memref<8x1xi32, #tpu.memory_space<vmem>>, %arg7: memref<8x1xf32, #tpu.memory_space<vmem>>) attributes {dimension_semantics = [#tpu.dimension_semantics<parallel>], iteration_bounds = array<i64: 1>, scalar_prefetch = 0 : i64, scratch_operands = 0 : i64, tpu.core_type = #tpu.core_type<tc>, window_params = [{transform_indices = @transform_0, window_bounds = array<i64: 8, 1>}, {transform_indices = @transform_1, window_bounds = array<i64: 8, 256>}, {pipeline_mode = #tpu.pipeline_mode<synchronous>, transform_indices = @transform_2, window_bounds = array<i64: 128, 256>}, {pipeline_mode = #tpu.pipeline_mode<synchronous>, transform_indices = @transform_3, window_bounds = array<i64: 1, 128>}, {transform_indices = @transform_4, window_bounds = array<i64: 8, 256>}, {transform_indices = @transform_5, window_bounds = array<i64: 8, 1>}, {transform_indices = @transform_6, window_bounds = array<i64: 8, 1>}]} {
    %c0 = arith.constant 0 : index
    %c0_0 = arith.constant 0 : index
    %0 = vector.load %arg2[%c0, %c0_0] : memref<8x256xf32, #tpu.memory_space<vmem>>, vector<8x256xf32>
    %c0_1 = arith.constant 0 : index
    %c0_2 = arith.constant 0 : index
    %1 = vector.load %arg3[%c0_1, %c0_2] : memref<128x256xf32, #tpu.memory_space<vmem>>, vector<128x256xf32>
    %2 = arith.mulf %0, %0 : vector<8x256xf32>
    %cst = arith.constant dense<0.000000e+00> : vector<8xf32>
    %3 = vector.multi_reduction <add>, %2, %cst [1] : vector<8x256xf32> to vector<8xf32>
    %4 = vector.shape_cast %3 : vector<8xf32> to vector<8x1xf32>
    %cst_3 = arith.constant dense<0.000000e+00> : vector<8x128xf32>
    %5 = tpu.matmul %0, %1, %cst_3 {dimension_numbers = #tpu.dot_dimension_numbers<[1], [1], [0], [0], [0, 0, 1, 0], [], []>} : vector<8x256xf32>, vector<128x256xf32>, vector<8x128xf32> -> vector<8x128xf32>
    %c0_4 = arith.constant 0 : index
    %c0_5 = arith.constant 0 : index
    %6 = vector.load %arg4[%c0_4, %c0_5] : memref<1x128xf32, #tpu.memory_space<vmem>>, vector<1x128xf32>
    %7 = vector.broadcast %4 : vector<8x1xf32> to vector<8x128xf32>
    %8 = vector.broadcast %6 : vector<1x128xf32> to vector<8x128xf32>
    %9 = arith.addf %7, %8 : vector<8x128xf32>
    %cst_6 = arith.constant 2.000000e+00 : f32
    %10 = vector.broadcast %cst_6 : f32 to vector<8x128xf32>
    %11 = arith.mulf %10, %5 : vector<8x128xf32>
    %12 = arith.subf %9, %11 : vector<8x128xf32>
    %13 = tpu.iota {dimensions = array<i32: 1>} : vector<8x128xi32>
    %c0_7 = arith.constant 0 : index
    %c0_8 = arith.constant 0 : index
    %14 = vector.load %arg1[%c0_7, %c0_8] : memref<8x1xi32, #tpu.memory_space<vmem>>, vector<8x1xi32>
    %15 = vector.broadcast %14 : vector<8x1xi32> to vector<8x128xi32>
    %16 = arith.cmpi sge, %13, %15 : vector<8x128xi32>
    %c16_i32 = arith.constant 16 : i32
    %17 = vector.broadcast %c16_i32 : i32 to vector<8x1xi32>
    %18 = arith.addi %14, %17 : vector<8x1xi32>
    %19 = vector.broadcast %18 : vector<8x1xi32> to vector<8x128xi32>
    %20 = arith.cmpi slt, %13, %19 : vector<8x128xi32>
    %21 = arith.andi %16, %20 : vector<8x128xi1>
    %cst_9 = arith.constant 1.000000e+30 : f32
    %22 = vector.broadcast %cst_9 : f32 to vector<8x128xf32>
    %23 = arith.select %21, %12, %22 : vector<8x128xi1>, vector<8x128xf32>
    %cst_10 = arith.constant dense<0x7F800000> : vector<8xf32>
    %24 = vector.multi_reduction <minimumf>, %23, %cst_10 [1] : vector<8x128xf32> to vector<8xf32>
    %25 = vector.shape_cast %24 : vector<8xf32> to vector<8x1xf32>
    %26 = vector.broadcast %25 : vector<8x1xf32> to vector<8x128xf32>
    %27 = arith.cmpf ole, %23, %26 : vector<8x128xf32>
    %c128_i32 = arith.constant 128 : i32
    %28 = vector.broadcast %c128_i32 : i32 to vector<8x128xi32>
    %29 = arith.select %27, %13, %28 : vector<8x128xi1>, vector<8x128xi32>
    %cst_11 = arith.constant dense<2147483647> : vector<8xi32>
    %30 = vector.multi_reduction <minsi>, %29, %cst_11 [1] : vector<8x128xi32> to vector<8xi32>
    %31 = vector.shape_cast %30 : vector<8xi32> to vector<8x1xi32>
    %32 = vector.broadcast %31 : vector<8x1xi32> to vector<8x128xi32>
    %33 = arith.cmpi eq, %13, %32 : vector<8x128xi32>
    %34 = arith.extui %33 : vector<8x128xi1> to vector<8x128xi32>
    %35 = arith.sitofp %34 : vector<8x128xi32> to vector<8x128xf32>
    %cst_12 = arith.constant dense<0.000000e+00> : vector<8x256xf32>
    %36 = tpu.matmul %35, %1, %cst_12 {dimension_numbers = #tpu.dot_dimension_numbers<[1], [0], [0], [1], [0, 0, 1, 1], [], []>} : vector<8x128xf32>, vector<128x256xf32>, vector<8x256xf32> -> vector<8x256xf32>
    %c0_13 = arith.constant 0 : index
    %c0_14 = arith.constant 0 : index
    %37 = vector.load %arg5[%c0_13, %c0_14] : memref<8x256xf32, #tpu.memory_space<vmem>>, vector<8x256xf32>
    tpu.vector_store %arg5[%c0_13, %c0_14], %36 {strides = array<i32>} : memref<8x256xf32, #tpu.memory_space<vmem>>, vector<8x256xf32>,
    %38 = arith.subi %31, %14 : vector<8x1xi32>
    %c0_15 = arith.constant 0 : index
    %c0_16 = arith.constant 0 : index
    %39 = vector.load %arg6[%c0_15, %c0_16] : memref<8x1xi32, #tpu.memory_space<vmem>>, vector<8x1xi32>
    tpu.vector_store %arg6[%c0_15, %c0_16], %38 {strides = array<i32>} : memref<8x1xi32, #tpu.memory_space<vmem>>, vector<8x1xi32>,
    %40 = arith.subf %36, %0 : vector<8x256xf32>
    %41 = arith.mulf %40, %40 : vector<8x256xf32>
    %cst_17 = arith.constant dense<0.000000e+00> : vector<8xf32>
    %42 = vector.multi_reduction <add>, %41, %cst_17 [1] : vector<8x256xf32> to vector<8xf32>
    %43 = vector.shape_cast %42 : vector<8xf32> to vector<8x1xf32>
    %cst_18 = arith.constant 3.906250e-03 : f32
    %44 = vector.broadcast %cst_18 : f32 to vector<8x1xf32>
    %45 = arith.mulf %43, %44 : vector<8x1xf32>
    %c0_19 = arith.constant 0 : index
    %c0_20 = arith.constant 0 : index
    %46 = vector.load %arg7[%c0_19, %c0_20] : memref<8x1xf32, #tpu.memory_space<vmem>>, vector<8x1xf32>
    tpu.vector_store %arg7[%c0_19, %c0_20], %45 {strides = array<i32>} : memref<8x1xf32, #tpu.memory_space<vmem>>, vector<8x1xf32>,
    return
  }
  func.func @transform_0(%arg0: i32) -> (i32, i32) {
    %c0_i32 = arith.constant 0 : i32
    %c0_i32_0 = arith.constant 0 : i32
    return %arg0, %c0_i32 : i32, i32
  }
  func.func @transform_1(%arg0: i32) -> (i32, i32) {
    %c0_i32 = arith.constant 0 : i32
    %c0_i32_0 = arith.constant 0 : i32
    return %arg0, %c0_i32 : i32, i32
  }
  func.func @transform_2(%arg0: i32) -> (i32, i32) {
    %c0_i32 = arith.constant 0 : i32
    %c0_i32_0 = arith.constant 0 : i32
    %c0_i32_1 = arith.constant 0 : i32
    return %c0_i32, %c0_i32_0 : i32, i32
  }
  func.func @transform_3(%arg0: i32) -> (i32, i32) {
    %c0_i32 = arith.constant 0 : i32
    %c0_i32_0 = arith.constant 0 : i32
    %c0_i32_1 = arith.constant 0 : i32
    return %c0_i32, %c0_i32_0 : i32, i32
  }
  func.func @transform_4(%arg0: i32) -> (i32, i32) {
    %c0_i32 = arith.constant 0 : i32
    %c0_i32_0 = arith.constant 0 : i32
    return %arg0, %c0_i32 : i32, i32
  }
  func.func @transform_5(%arg0: i32) -> (i32, i32) {
    %c0_i32 = arith.constant 0 : i32
    %c0_i32_0 = arith.constant 0 : i32
    return %arg0, %c0_i32 : i32, i32
  }
  func.func @transform_6(%arg0: i32) -> (i32, i32) {
    %c0_i32 = arith.constant 0 : i32
    %c0_i32_0 = arith.constant 0 : i32
    return %arg0, %c0_i32 : i32, i32
  }
}

</mosaic_0001>

<bundles_post_ra>
// kernel: tpu_custom_call.1
= control target key start
LH: loop header
LB: loop body
LE: loop exit
PB: predicated region body
PF: predicated region fallthrough
CT: control target
= control target key end

     0   :  { %12 = vsyncpa [#allocation3], 0  ;;  %s576_s0 = inlined_call_operand.vmem [shape: s32[8,1], index: 0, kind: input, shape index: {}]   ;;  %s577_s1 = inlined_call_operand.hbm [shape: f32[8,256], index: 1, kind: input, shape index: {}]   ;;  %s578_s2 = inlined_call_operand.hbm [shape: f32[128,256], index: 2, kind: input, shape index: {}]   ;;  %s579_s3 = inlined_call_operand.vmem [shape: f32[1,128], index: 3, kind: input, shape index: {}]   ;;  %s580_s4 = inlined_call_operand.hbm [shape: f32[8,256], index: 4, kind: output, shape index: {0}]   ;;  %s581_s5 = inlined_call_operand.vmem [shape: s32[8,1], index: 5, kind: output, shape index: {1}]   ;;  %s582_s6 = inlined_call_operand.vmem [shape: f32[8,1], index: 6, kind: output, shape index: {2}]  }
   0x1   :  { %13 = vsyncpa [#allocation6], 0 }
   0x2   :  { %14 = vsyncpa [#allocation4], 0  ;;  %s459_s21 = smov [#allocation2]   ;;  %s460_s23 = smov [#allocation5]  }
   0x3   :  { %s23_s22 = sshll.u32 %s459_s21, 4  ;;  %s32_s24 = sshll.u32 %s460_s23, 4  ;;  %s24_s22 = int_to_ptr.vmem [resolvable:$true] %s23_s22  ;;  %s502_s24 = int_to_ptr.vmem [resolvable:$true] %s32_s24 }
   0x4   :  { %s387_s27 = scalar_lea.hbm %s577_s1, 256 }
   0x5   :  { %p388_p0 = scmp.ne.s32.totalorder %s577_s1, %s387_s27  ;;  %p391_p1 = scmp.lt.u32.totalorder %s387_s27, %s577_s1 }
   0x7   :  { %p393_p2 = pnand %p391_p1, %p388_p0 }
   0x9   :  { %396 = shalt.err (!%p393_p2)
}
   0xa   :  { %s397_s8 = scalar_lea.vmem %s24_s22, 256  ;;  %p402_p4 = scmp.lt.s32.totalorder %s24_s22, %s24_s22 }
   0xb   :  { %p398_p3 = scmp.ne.s32.totalorder %s24_s22, %s397_s8  ;;  %p403_p5 = scmp.lt.s32.totalorder %s397_s8, %s397_s8 }
   0xd   :  { %p404_p6 = por %p403_p5, %p402_p4 }
   0xf   :  { %p405_p7 = pnand %p404_p6, %p398_p3 }
  0x11   :  { %408 = shalt.err (!%p405_p7)
}
  0x12   :  { %26 = dma.hbm_to_vmem [thread:$0]  %s577_s1, 256, %s24_s22, [#allocation3]  }
  0x13   :  { %s409_s13 = scalar_lea.hbm %s578_s2, 4096 }
  0x14   :  { %p410_p8 = scmp.ne.s32.totalorder %s578_s2, %s409_s13  ;;  %p413_p9 = scmp.lt.u32.totalorder %s409_s13, %s578_s2 }
  0x16   :  { %p415_p10 = pnand %p413_p9, %p410_p8 }
  0x18   :  { %418 = shalt.err (!%p415_p10)
}
  0x19   :  { %s419_s18 = scalar_lea.vmem %s502_s24, 4096  ;;  %p424_p12 = scmp.lt.s32.totalorder %s502_s24, %s502_s24 }
  0x1a   :  { %p420_p11 = scmp.ne.s32.totalorder %s502_s24, %s419_s18  ;;  %p425_p13 = scmp.lt.s32.totalorder %s419_s18, %s419_s18 }
  0x1c   :  { %p426_p0 = por %p425_p13, %p424_p12 }
  0x1e   :  { %p427_p1 = pnand %p426_p0, %p420_p11 }
  0x20   :  { %430 = shalt.err (!%p427_p1)
}
  0x21   :  { %s461_s1 = smov 256   ;;  %s462_s19 = smov 16  }
  0x22   :  { %38 = dma.hbm_to_vmem [thread:$0]  %s578_s2, 4096, %s502_s24, [#allocation6], %s461_s1, %s461_s1, %s462_s19  }
  0x23   :  { %453 = dma.done.wait [#allocation3], 256  }
  0x24   :  { %454 = vsyncadd [#allocation3], 4294967040 }
  0x25   :  { %455 = dma.done.wait [#allocation6], 4096  }
  0x26   :  { %456 = vsyncadd [#allocation6], 4294963200  ;;  %v463_v0 = vmov 0   ;;  %v50_v1 = vld [vmem:[#allocation5 + $0x8] sm:$0xff]  ;;  %v52_v2 = vld [vmem:[#allocation5 + $0x18] sm:$0xff]  ;;  %v166_v56 = vlaneseq  ;;  %vm275_vm5 = vcmask 7168  }
  0x27   :  { %386 = vset.pattern.permute.xlu1 %v463_v0  ;;  %385 = vset.pattern.permute.xlu0 %v463_v0  ;;  %v49_v3 = vld [vmem:[#allocation5] sm:$0xff]  ;;  %v313_v4 = vpack.c.bf16 %v52_v2, %v50_v1  ;;  %v51_v5 = vld [vmem:[#allocation5 + $0x10] sm:$0xff]  ;;  %v54_v6 = vld [vmem:[#allocation5 + $0x28] sm:$0xff]  ;;  %s466_s25 = smov [#allocation7]  }
  0x28   :  { %v56_v7 = vld [vmem:[#allocation5 + $0x38] sm:$0xff]  ;;  %v315_v8 = vpack.c.bf16 %v51_v5, %v49_v3  ;;  %v53_v10 = vld [vmem:[#allocation5 + $0x20] sm:$0xff]  ;;  %v55_v11 = vld [vmem:[#allocation5 + $0x30] sm:$0xff]  ;;  %v167_v58 = vand.u32 127, %v166_v56  ;;  %s292_s26 = sshll.u32 %s466_s25, 4  ;;  %s293_s26 = int_to_ptr.vmem [resolvable:$true] %s292_s26 }
  0x29   :  { %v317_v9 = vpack.c.bf16 %v56_v7, %v54_v6  ;;  %314 = vmatprep.subr.bf16.mxu0 %v313_v4  ;;  %346 = vmatprep.subr.bf16.mxu1 %v313_v4  ;;  %v58_v12 = vld [vmem:[#allocation5 + $0x48] sm:$0xff]  ;;  %v60_v13 = vld [vmem:[#allocation5 + $0x58] sm:$0xff]  ;;  %v319_v14 = vpack.c.bf16 %v55_v11, %v53_v10  ;;  %v57_v16 = vld [vmem:[#allocation5 + $0x40] sm:$0xff]  ;;  %s431_s27 = scalar_lea.vmem %s293_s26, 256  ;;  %p436_p3 = scmp.lt.s32.totalorder %s293_s26, %s293_s26 }
  0x2a   :  { %316 = vmatpush1.bf16.xpose.msra.mxu0 %v315_v8  ;;  %348 = vmatpush1.bf16.msra.mxu1 %v315_v8  ;;  %v321_v15 = vpack.c.bf16 %v60_v13, %v58_v12  ;;  %v59_v17 = vld [vmem:[#allocation5 + $0x50] sm:$0xff]  ;;  %v62_v18 = vld [vmem:[#allocation5 + $0x68] sm:$0xff]  ;;  %v64_v19 = vld [vmem:[#allocation5 + $0x78] sm:$0xff]  ;;  %v464_v12 = vmov 0.0   ;;  %p432_p2 = scmp.ne.s32.totalorder %s293_s26, %s431_s27  ;;  %p437_p4 = scmp.lt.s32.totalorder %s431_s27, %s431_s27 }
  0x2b   :  { %318 = vmatprep.subr.bf16.mxu0 %v317_v9  ;;  %350 = vmatprep.subr.bf16.mxu1 %v317_v9  ;;  %v323_v20 = vpack.c.bf16 %v59_v17, %v57_v16  ;;  %v61_v21 = vld [vmem:[#allocation5 + $0x60] sm:$0xff]  ;;  %v533_v22 = vld [vmem:[#allocation2 + $0x8] sm:$0xff]  ;;  %v325_v23 = vpack.c.bf16 %v64_v19, %v62_v18  ;;  %v63_v24 = vld [vmem:[#allocation5 + $0x70] sm:$0xff]  ;;  %v465_v19 = vmov 1.0  }
  0x2c   :  { %150 = vmatprep.mubr.f32.mxu0 %v533_v22  ;;  %v536_v25 = vld [vmem:[#allocation2] sm:$0xff]  ;;  %v82_v26 = vmul.f32 %v533_v22, %v533_v22  ;;  %v543_v27 = vld [vmem:[%s576_s0] sm:$0xff]  ;;  %v66_v28 = vld [vmem:[#allocation5 + $0x88] sm:$0xff]  ;;  %v327_v32 = vpack.c.bf16 %v63_v24, %v61_v21  ;;  %265 = vmatprep.mubr.f32.mxu1 %v464_v12  ;;  %p438_p5 = por %p437_p4, %p436_p3 }
  0x2d   :  { %v68_v29 = vld [vmem:[#allocation5 + $0x98] sm:$0xff]  ;;  %v81_v30 = vmul.f32 %v536_v25, %v536_v25  ;;  %v173_v31 = vadd.s32 16, %v543_v27  ;;  %v65_v35 = vld [vmem:[#allocation5 + $0x80] sm:$0xff]  ;;  %v67_v36 = vld [vmem:[#allocation5 + $0x90] sm:$0xff] }
  0x2e   :  { %352 = vmatpush1.bf16.msra.mxu1 %v319_v14  ;;  %v329_v34 = vpack.c.bf16 %v68_v29, %v66_v28  ;;  %v70_v37 = vld [vmem:[#allocation5 + $0xa8] sm:$0xff]  ;;  %v72_v38 = vld [vmem:[#allocation5 + $0xb8] sm:$0xff]  ;;  %v331_v39 = vpack.c.bf16 %v67_v36, %v65_v35  ;;  %v69_v41 = vld [vmem:[#allocation5 + $0xa0] sm:$0xff]  ;;  %p439_p6 = pnand %p438_p5, %p432_p2 }
  0x2f   :  { %354 = vmatprep.subr.bf16.mxu1 %v321_v15  ;;  %v83_v33 = vadd.f32 %v82_v26, %v81_v30  ;;  %175 = vperm.xlu1 %386, %v173_v31   ;;  %v333_v40 = vpack.c.bf16 %v72_v38, %v70_v37  ;;  %v71_v42 = vld [vmem:[#allocation5 + $0xb0] sm:$0xff]  ;;  %v74_v43 = vld [vmem:[#allocation5 + $0xc8] sm:$0xff]  ;;  %v76_v44 = vld [vmem:[#allocation5 + $0xd8] sm:$0xff] }
  0x30   :  { %v335_v45 = vpack.c.bf16 %v71_v42, %v69_v41  ;;  %v337_v46 = vpack.c.bf16 %v76_v44, %v74_v43  ;;  %v73_v47 = vld [vmem:[#allocation5 + $0xc0] sm:$0xff]  ;;  %v75_v48 = vld [vmem:[#allocation5 + $0xd0] sm:$0xff]  ;;  %v78_v49 = vld [vmem:[#allocation5 + $0xe8] sm:$0xff] }
  0x31   :  { %84 = vadd.xlane.f32.xlu0 %v83_v33  ;;  %v80_v50 = vld [vmem:[#allocation5 + $0xf8] sm:$0xff]  ;;  %v339_v51 = vpack.c.bf16 %v75_v48, %v73_v47  ;;  %v77_v53 = vld [vmem:[#allocation5 + $0xe0] sm:$0xff]  ;;  %v79_v54 = vld [vmem:[#allocation5 + $0xf0] sm:$0xff] }
  0x32   :  { %320 = vmatpush1.bf16.xpose.msra.mxu0 %v319_v14  ;;  %356 = vmatpush1.bf16.msra.mxu1 %v323_v20  ;;  %v341_v52 = vpack.c.bf16 %v80_v50, %v78_v49  ;;  %v343_v55 = vpack.c.bf16 %v79_v54, %v77_v53  ;;  %v310_v61 = vld [vmem:[%s579_s3] ss:$0 sm:$0xff] }
  0x33   :  { %322 = vmatprep.subr.bf16.mxu0 %v321_v15  ;;  %358 = vmatprep.subr.bf16.mxu1 %v325_v23 }
  0x36   :  { %360 = vmatpush1.bf16.msra.mxu1 %v327_v32 }
  0x37   :  { %362 = vmatprep.subr.bf16.mxu1 %v329_v34 }
  0x3a   :  { %324 = vmatpush1.bf16.xpose.msra.mxu0 %v323_v20  ;;  %364 = vmatpush1.bf16.msra.mxu1 %v331_v39 }
  0x3b   :  { %326 = vmatprep.subr.bf16.mxu0 %v325_v23  ;;  %366 = vmatprep.subr.bf16.mxu1 %v333_v40 }
  0x3e   :  { %368 = vmatpush1.bf16.msra.mxu1 %v335_v45 }
  0x3f   :  { %370 = vmatprep.subr.bf16.mxu1 %v337_v46 }
  0x42   :  { %328 = vmatpush1.bf16.xpose.msra.mxu0 %v327_v32  ;;  %372 = vmatpush1.bf16.msra.mxu1 %v339_v51 }
  0x43   :  { %330 = vmatprep.subr.bf16.mxu0 %v329_v34  ;;  %374 = vmatprep.subr.bf16.mxu1 %v341_v52 }
  0x46   :  { %376 = vmatpush1.bf16.msra.mxu1 %v343_v55 }
  0x47   :  { %170 = vperm.xlu0 %385, %v543_v27  }
  0x4a   :  { %332 = vmatpush1.bf16.xpose.msra.mxu0 %v331_v39 }
  0x4b   :  { %334 = vmatprep.subr.bf16.mxu0 %v333_v40 }
  0x52   :  { %336 = vmatpush1.bf16.xpose.msra.mxu0 %v335_v45 }
  0x53   :  { %338 = vmatprep.subr.bf16.mxu0 %v337_v46 }
  0x5a   :  { %340 = vmatpush1.bf16.xpose.msra.mxu0 %v339_v51 }
  0x5b   :  { %342 = vmatprep.subr.bf16.mxu0 %v341_v52 }
  0x62   :  { %344 = vmatpush1.bf16.xpose.msra.mxu0 %v343_v55 }
  0x69   :  { %151 = vmatmul.mubr.f32.vlgmr.msra.gmra.mrb[0].mxu0 %v536_v25 }
  0xae   :  { %v176_v59 = vpop.permute.xlu1 %175 }
  0xaf   :  { %vm177_vm0 = vcmp.lt.s32.totalorder %v167_v58, %v176_v59 }
  0xbe   :  { %v85_v57 = vpop.xlane.xlu0 %84 }
  0xbf   :  { %v163_v63 = vadd.f32 %v310_v61, %v85_v57 }
  0xc6   :  { %v171_v60 = vpop.permute.xlu0 %170 }
  0xc7   :  { %vm172_vm1 = vcmp.ge.s32.totalorder %v167_v58, %v171_v60 }
  0xc8   :  { %vm178_vm2 = vmand %vm172_vm1, %vm177_vm0 }
 0x13c   :  { %v152_v62 = vpop.f32.mrb[0].mxu0 }
 0x13d   :  { %v164_v0 = vmul.f32 2.0, %v152_v62  ;;  %v154_v1 = vpop.f32.mrb[1].mxu0 }
 0x13f   :  { %v165_v2 = vsub.f32 %v163_v63, %v164_v0 }
 0x141   :  { %v179_v3 = vsel %vm178_vm2, %v165_v2, 1e+30 }
 0x142   :  { %180 = vmin.xlane.f32.xlu1 %v179_v3 }
 0x1cf   :  { %v181_v4 = vpop.xlane.xlu1 %180 }
 0x1d0   :  { %vm182_vm3 = vcmp.le.f32.partialorder %v179_v3, %v181_v4 }
 0x1d1   :  { %v183_v5 = vsel %vm182_vm3, %v167_v58, 128 }
 0x1d2   :  { %v185_v6 = vshra.s32 %v183_v5, 16  ;;  %v184_v8 = vand.u32 65535, %v183_v5 }
 0x1d4   :  { %v187_v7 = vcvt.s32.f32 %v185_v6  ;;  %v186_v10 = vcvt.s32.f32 %v184_v8 }
 0x1d6   :  { %188 = vmin.xlane.f32.xlu1 %v187_v7 }
 0x263   :  { %v189_v9 = vpop.xlane.xlu1 %188 }
 0x264   :  { %vm190_vm4 = vcmp.eq.f32.partialorder %v187_v7, %v189_v9  ;;  %v195_v13 = vcvt.f32.s32 %v189_v9 }
 0x265   :  { %v191_v11 = vsel %vm190_vm4, %v186_v10, inf }
 0x266   :  { %192 = vmin.xlane.f32.xlu1 %v191_v11  ;;  %v196_v15 = vshll.u32 %v195_v13, 16 }
 0x2f3   :  { %v193_v14 = vpop.xlane.xlu1 %192 }
 0x2f4   :  { %v194_v16 = vcvt.f32.s32 %v193_v14 }
 0x2f6   :  { %v197_v17 = vadd.s32 %v196_v15, %v194_v16 }
 0x2f8   :  { %v274_v18 = vsub.s32 %v197_v17, %v543_v27  ;;  %vm198_vm6 = vcmp.eq.s32.totalorder %v167_v58, %v197_v17 }
 0x2f9   :  { %312 = vmatmul.mubr.msk.f32.vlgmr.msra.gmra.mrb[0].mxu1 %vm198_vm6, %v465_v19 }
 0x2fa   :  { %276 = vst.msk [vmem:[%s581_s5] sm:$0xff] %vm275_vm5, %v274_v18 }
 0x3cc   :  { %v267_v20 = vpop.f32.mrb[0].mxu1 }
 0x3cd   :  { %272 = vst [vmem:[#allocation7] sm:$0xff] %v267_v20  ;;  %v277_v21 = vsub.f32 %v267_v20, %v536_v25  ;;  %v269_v23 = vpop.f32.mrb[1].mxu1 }
 0x3ce   :  { %273 = vst [vmem:[#allocation7 + $0x8] sm:$0xff] %v269_v23  ;;  %v278_v24 = vsub.f32 %v269_v23, %v533_v22 }
 0x3cf   :  { %v279_v26 = vmul.f32 %v277_v21, %v277_v21 }
 0x3d0   :  { %v280_v28 = vmul.f32 %v278_v24, %v278_v24 }
 0x3d2   :  { %v281_v29 = vadd.f32 %v280_v28, %v279_v26 }
 0x3d4   :  { %282 = vadd.xlane.f32.xlu0 %v281_v29 }
 0x3d5   :  { %442 = shalt.err (!%p439_p6)
}
 0x3d6   :  { %s443_s29 = scalar_lea.hbm %s580_s4, 256 }
 0x3d7   :  { %p444_p7 = scmp.ne.s32.totalorder %s580_s4, %s443_s29  ;;  %p447_p8 = scmp.lt.u32.totalorder %s443_s29, %s580_s4 }
 0x3d9   :  { %p449_p9 = pnand %p447_p8, %p444_p7 }
 0x3db   :  { %452 = shalt.err (!%p449_p9)
}
 0x3dc   :  { %295 = dma.vmem_to_hbm [thread:$0]  %s293_s26, 256, %s580_s4, [#allocation4]  }
 0x461   :  { %v283_v22 = vpop.xlane.xlu0 %282 }
 0x462   :  { %v284_v25 = vmul.f32 0.00390625, %v283_v22 }
 0x464   :  { %285 = vst.msk [vmem:[%s582_s6] sm:$0xff] %vm275_vm5, %v284_v25 }
 0x465   :  { %457 = dma.done.wait [#allocation4], 256  }
 0x466   :  { %458 = vsyncadd [#allocation4], 4294967040 }
 0x467   :  { %307 = vsyncpa [#allocation3], 1 }
 0x468   :  { %308 = vsyncpa [#allocation6], 1 }
 0x469   :  { %309 = vsyncpa [#allocation4], 1 }

</bundles_post_ra>
